<compile_context>
chip_gen: v7x
topology: tpu7x:2x2x1
jax: 0.10.0
libtpu: 0.0.40
codegen_flags: <defaults>
</compile_context>

<pallas_src>
import jax
import jax.numpy as jnp
from jax.experimental import pallas as pl
from jax.experimental.pallas import tpu as pltpu


_STATE_DIM = 4
_HIDDEN = 16
_ACTION_DIM = 2

# Below this batch size the fixed pallas_call launch cost dominates; let XLA
# fuse the plain jnp expression with surrounding ops instead.
_SMALL_BATCH_FALLBACK = 2048

# Keep at least this many grid steps (when B allows) so v7x's two TensorCores
# both get work on the "parallel" batch axis and the DMA pipeline has depth.
_MIN_GRID_STEPS = 4

# Explicit scoped-VMEM limit: ~33 MiB needed at TB=128K (double-buffered I/O
# blocks + the [16, TB] f32 hidden intermediate) + headroom, kept below v7x's
# 64 MiB physical VMEM.
_VMEM_LIMIT_BYTES = 48 << 20


def _round_up(v, m):
    return ((v + m - 1) // m) * m


def _mlp_kernel(xT_ref, w1_ref, b1_ref, w2_ref, b2_ref, oT_ref):
    # xT_ref: [state_dim, TB]      (batch on the lane axis)
    # w1_ref: [hidden, state_dim]  (PyTorch [out, in] layout)
    # b1_ref: [hidden, 1]
    # w2_ref: [action_dim, hidden]
    # b2_ref: [action_dim, 1]
    # oT_ref: [action_dim, TB]

    # h^T = W1 @ x^T + b1   -> [hidden, TB]
    # NOTE(v5e): if the bundle dump shows the MXU feed/drain (K=4 contraction,
    # sequential MRF pops scaling with TB) on the critical path, this first
    # contraction can be rewritten as 4 broadcast multiply-adds on the VPU.
    h = jnp.dot(w1_ref[...], xT_ref[...].astype(w1_ref.dtype),
                preferred_element_type=jnp.float32)
    h = jnp.maximum(h + b1_ref[...], 0.0)          # bias broadcasts over lanes

    # y^T = W2 @ h^T + b2   -> [action_dim, TB]
    y = jnp.dot(w2_ref[...], h.astype(w2_ref.dtype),
                preferred_element_type=jnp.float32)
    y = y + b2_ref[...]

    oT_ref[...] = y.astype(oT_ref.dtype)           # lane-dense store (TB lanes)


def _choose_batch_tile(B, block_b):
    """Batch tile: as large as block_b allows, multiple of 128, but keep
    >= _MIN_GRID_STEPS grid steps when B is big enough, and never (much)
    larger than B itself."""
    tb = min(block_b, max(128, _round_up(pl.cdiv(B, _MIN_GRID_STEPS), 128)))
    tb = min(tb, _round_up(B, 128))
    return tb


def net_forward_transposed(x_t, w1, b1, w2, b2, *, block_b=131072):
    """Preferred entry point: transposed I/O, no wrapper transposes.

    x_t: [state_dim, B]   float32 or bfloat16 (batch on the lane axis)
    w1:  [hidden, state_dim]   (PyTorch [out, in] layout)
    b1:  [hidden, 1]
    w2:  [action_dim, hidden]
    b2:  [action_dim, 1]
    returns: [action_dim, B]   float32
    """
    state_dim, B = x_t.shape
    hidden = w1.shape[0]
    action_dim = w2.shape[0]

    TB = _choose_batch_tile(B, block_b)
    grid_b = pl.cdiv(B, TB)

    itemsize_x = jnp.dtype(x_t.dtype).itemsize
    param_bytes = sum(int(a.size) * jnp.dtype(a.dtype).itemsize
                      for a in (w1, b1, w2, b2))
    cost = pl.CostEstimate(
        flops=2 * B * (state_dim * hidden + hidden * action_dim),
        transcendentals=0,
        bytes_accessed=int(x_t.size) * itemsize_x      # x stream
                       + B * action_dim * 4            # f32 output stream
                       + param_bytes,                  # weights (read once)
    )

    out_t = pl.pallas_call(
        _mlp_kernel,
        out_shape=jax.ShapeDtypeStruct((action_dim, B), jnp.float32),
        grid_spec=pl.GridSpec(
            grid=(grid_b,),
            in_specs=[
                # x^T: batch-tiled along lanes.
                pl.BlockSpec((state_dim, TB), lambda i: (0, i)),
                # Weights/biases: constant block index -> DMA'd once, VMEM-resident.
                pl.BlockSpec(w1.shape, lambda i: (0, 0)),
                pl.BlockSpec(b1.shape, lambda i: (0, 0)),
                pl.BlockSpec(w2.shape, lambda i: (0, 0)),
                pl.BlockSpec(b2.shape, lambda i: (0, 0)),
            ],
            out_specs=pl.BlockSpec((action_dim, TB), lambda i: (0, i)),
        ),
        compiler_params=pltpu.CompilerParams(
            # Batch tiles are independent -> pipeline + megacore-shard on v7x.
            dimension_semantics=("parallel",),
            vmem_limit_bytes=_VMEM_LIMIT_BYTES,
        ),
        cost_estimate=cost,
    )(x_t, w1, b1, w2, b2)

    return out_t  # [action_dim, B]


def net_forward(x, w1, b1, w2, b2, *, block_b=131072, use_pallas=None):
    """Forward pass with the module's native [B, state_dim] API.

    For small batches (or use_pallas=False) this returns the plain jnp
    expression so XLA can fuse it with surrounding ops.  For large batches it
    does the layout plumbing and calls the transposed Pallas kernel.
    Ideally the producer/consumer should use the transposed layout directly
    (net_forward_transposed) to avoid the extra HBM transpose traffic.
    """
    B = x.shape[0]
    if use_pallas is None:
        use_pallas = B >= _SMALL_BATCH_FALLBACK
    if not use_pallas:
        h = jnp.maximum(x @ w1.T + b1.T, 0.0)
        return h @ w2.T + b2.T

    out_t = net_forward_transposed(x.T, w1, b1, w2, b2, block_b=block_b)
    return out_t.T  # [B, action_dim]


def init_params(key):
    """Deterministic init matching Net.__init__.

    PyTorch stores Linear weights as [out, in]; we keep that layout (it is
    exactly what the transposed kernel consumes).  Weights ~ normal(0, 0.1)
    as in the module; biases use PyTorch's default Linear init
    U(-1/sqrt(fan_in), 1/sqrt(fan_in)), stored as [out, 1] columns.
    """
    k1, k2, k3, k4 = jax.random.split(key, 4)

    w1 = 0.1 * jax.random.normal(k1, (_HIDDEN, _STATE_DIM), dtype=jnp.float32)
    b1 = jax.random.uniform(k2, (_HIDDEN, 1), dtype=jnp.float32,
                            minval=-1.0 / jnp.sqrt(_STATE_DIM),
                            maxval=1.0 / jnp.sqrt(_STATE_DIM))

    w2 = 0.1 * jax.random.normal(k3, (_ACTION_DIM, _HIDDEN), dtype=jnp.float32)
    b2 = jax.random.uniform(k4, (_ACTION_DIM, 1), dtype=jnp.float32,
                            minval=-1.0 / jnp.sqrt(_HIDDEN),
                            maxval=1.0 / jnp.sqrt(_HIDDEN))

    return w1, b1, w2, b2


def reference_forward(x, w1, b1, w2, b2):
    h = jnp.maximum(x @ w1.T + b1.T, 0.0)
    return h @ w2.T + b2.T


if __name__ == "__main__":
    key = jax.random.PRNGKey(0)
    k_param, k_x_small, k_x_big = jax.random.split(key, 3)

    w1, b1, w2, b2 = init_params(k_param)

    # --- Small batch (module's test-style shape), forcing the Pallas path so
    # --- the kernel is exercised (normally this size takes the jnp fallback).
    batch = 8
    x = jax.random.normal(k_x_small, (batch, _STATE_DIM), dtype=jnp.float32)
    out = net_forward(x, w1, b1, w2, b2, use_pallas=True)
    out = jax.block_until_ready(out)
    ref = reference_forward(x, w1, b1, w2, b2)
    assert out.shape == (batch, _ACTION_DIM)
    assert jnp.allclose(out, ref, atol=1e-5, rtol=1e-5)

    # --- Multi-tile path through the preferred transposed entry point
    # --- (exercises >1 grid step and a partial final batch tile).
    big_batch = 608
    x_big_t = jax.random.normal(k_x_big, (_STATE_DIM, big_batch), dtype=jnp.float32)
    out_big_t = net_forward_transposed(x_big_t, w1, b1, w2, b2)
    out_big_t = jax.block_until_ready(out_big_t)
    ref_big = reference_forward(x_big_t.T, w1, b1, w2, b2)
    assert out_big_t.shape == (_ACTION_DIM, big_batch)
    assert jnp.allclose(out_big_t.T, ref_big, atol=1e-5, rtol=1e-5)

    print("KERNEL_OK")
</pallas_src>

<mosaic_0001>
module attributes {stable_mosaic.version = 11 : i64} {
  func.func @_mlp_kernel(%arg0: i32, %arg1: memref<4x128xf32, #tpu.memory_space<vmem>>, %arg2: memref<16x4xf32, #tpu.memory_space<vmem>>, %arg3: memref<16x1xf32, #tpu.memory_space<vmem>>, %arg4: memref<2x16xf32, #tpu.memory_space<vmem>>, %arg5: memref<2x1xf32, #tpu.memory_space<vmem>>, %arg6: memref<2x128xf32, #tpu.memory_space<vmem>>) attributes {dimension_semantics = [#tpu.dimension_semantics<parallel>], iteration_bounds = array<i64: 1>, scalar_prefetch = 0 : i64, scratch_operands = 0 : i64, tpu.core_type = #tpu.core_type<tc>, window_params = [{transform_indices = @transform_0, window_bounds = array<i64: 4, 128>}, {pipeline_mode = #tpu.pipeline_mode<synchronous>, transform_indices = @transform_1, window_bounds = array<i64: 16, 4>}, {pipeline_mode = #tpu.pipeline_mode<synchronous>, transform_indices = @transform_2, window_bounds = array<i64: 16, 1>}, {pipeline_mode = #tpu.pipeline_mode<synchronous>, transform_indices = @transform_3, window_bounds = array<i64: 2, 16>}, {pipeline_mode = #tpu.pipeline_mode<synchronous>, transform_indices = @transform_4, window_bounds = array<i64: 2, 1>}, {transform_indices = @transform_5, window_bounds = array<i64: 2, 128>}]} {
    %c0 = arith.constant 0 : index
    %c0_0 = arith.constant 0 : index
    %0 = vector.load %arg2[%c0, %c0_0] : memref<16x4xf32, #tpu.memory_space<vmem>>, vector<16x4xf32>
    %c0_1 = arith.constant 0 : index
    %c0_2 = arith.constant 0 : index
    %1 = vector.load %arg1[%c0_1, %c0_2] : memref<4x128xf32, #tpu.memory_space<vmem>>, vector<4x128xf32>
    %cst = arith.constant dense<0.000000e+00> : vector<16x128xf32>
    %2 = tpu.matmul %0, %1, %cst {dimension_numbers = #tpu.dot_dimension_numbers<[1], [0], [0], [1], [0, 0, 1, 1], [], []>} : vector<16x4xf32>, vector<4x128xf32>, vector<16x128xf32> -> vector<16x128xf32>
    %c0_3 = arith.constant 0 : index
    %c0_4 = arith.constant 0 : index
    %3 = vector.load %arg3[%c0_3, %c0_4] : memref<16x1xf32, #tpu.memory_space<vmem>>, vector<16x1xf32>
    %4 = vector.broadcast %3 : vector<16x1xf32> to vector<16x128xf32>
    %5 = arith.addf %2, %4 : vector<16x128xf32>
    %cst_5 = arith.constant 0.000000e+00 : f32
    %6 = vector.broadcast %cst_5 : f32 to vector<16x128xf32>
    %7 = arith.maximumf %5, %6 : vector<16x128xf32>
    %c0_6 = arith.constant 0 : index
    %c0_7 = arith.constant 0 : index
    %8 = vector.load %arg4[%c0_6, %c0_7] : memref<2x16xf32, #tpu.memory_space<vmem>>, vector<2x16xf32>
    %cst_8 = arith.constant dense<0.000000e+00> : vector<2x128xf32>
    %9 = tpu.matmul %8, %7, %cst_8 {dimension_numbers = #tpu.dot_dimension_numbers<[1], [0], [0], [1], [0, 0, 1, 1], [], []>} : vector<2x16xf32>, vector<16x128xf32>, vector<2x128xf32> -> vector<2x128xf32>
    %c0_9 = arith.constant 0 : index
    %c0_10 = arith.constant 0 : index
    %10 = vector.load %arg5[%c0_9, %c0_10] : memref<2x1xf32, #tpu.memory_space<vmem>>, vector<2x1xf32>
    %11 = vector.broadcast %10 : vector<2x1xf32> to vector<2x128xf32>
    %12 = arith.addf %9, %11 : vector<2x128xf32>
    %c0_11 = arith.constant 0 : index
    %c0_12 = arith.constant 0 : index
    %13 = vector.load %arg6[%c0_11, %c0_12] : memref<2x128xf32, #tpu.memory_space<vmem>>, vector<2x128xf32>
    tpu.vector_store %arg6[%c0_11, %c0_12], %12 {strides = array<i32>} : memref<2x128xf32, #tpu.memory_space<vmem>>, vector<2x128xf32>,
    return
  }
  func.func @transform_0(%arg0: i32) -> (i32, i32) {
    %c0_i32 = arith.constant 0 : i32
    %c0_i32_0 = arith.constant 0 : i32
    return %c0_i32, %arg0 : i32, i32
  }
  func.func @transform_1(%arg0: i32) -> (i32, i32) {
    %c0_i32 = arith.constant 0 : i32
    %c0_i32_0 = arith.constant 0 : i32
    %c0_i32_1 = arith.constant 0 : i32
    return %c0_i32, %c0_i32_0 : i32, i32
  }
  func.func @transform_2(%arg0: i32) -> (i32, i32) {
    %c0_i32 = arith.constant 0 : i32
    %c0_i32_0 = arith.constant 0 : i32
    %c0_i32_1 = arith.constant 0 : i32
    return %c0_i32, %c0_i32_0 : i32, i32
  }
  func.func @transform_3(%arg0: i32) -> (i32, i32) {
    %c0_i32 = arith.constant 0 : i32
    %c0_i32_0 = arith.constant 0 : i32
    %c0_i32_1 = arith.constant 0 : i32
    return %c0_i32, %c0_i32_0 : i32, i32
  }
  func.func @transform_4(%arg0: i32) -> (i32, i32) {
    %c0_i32 = arith.constant 0 : i32
    %c0_i32_0 = arith.constant 0 : i32
    %c0_i32_1 = arith.constant 0 : i32
    return %c0_i32, %c0_i32_0 : i32, i32
  }
  func.func @transform_5(%arg0: i32) -> (i32, i32) {
    %c0_i32 = arith.constant 0 : i32
    %c0_i32_0 = arith.constant 0 : i32
    return %c0_i32, %arg0 : i32, i32
  }
}

</mosaic_0001>

<bundles_post_ra>
// kernel: tpu_custom_call.1
= control target key start
LH: loop header
LB: loop body
LE: loop exit
PB: predicated region body
PF: predicated region fallthrough
CT: control target
= control target key end

     0   :  { %vm43_vm0 = vcmask 1043456   ;;  %vm36_vm1 = vcmask 31744   ;;  %s344_s0 = inlined_call_operand.vmem [shape: f32[4,8], index: 0, kind: input, shape index: {}]   ;;  %s345_s1 = inlined_call_operand.vmem [shape: f32[16,4], index: 1, kind: input, shape index: {}]   ;;  %s346_s2 = inlined_call_operand.vmem [shape: f32[16,1], index: 2, kind: input, shape index: {}]   ;;  %s347_s3 = inlined_call_operand.vmem [shape: f32[2,16], index: 3, kind: input, shape index: {}]   ;;  %s348_s4 = inlined_call_operand.vmem [shape: f32[2,1], index: 4, kind: input, shape index: {}]   ;;  %s349_s5 = inlined_call_operand.hbm [shape: f32[2,8], index: 5, kind: output, shape index: {}]  }
   0x1   :  { %v23_v0 = vld [vmem:[%s344_s0] sm:$0xf]  ;;  %v22_v2 = vld [vmem:[%s345_s1 + $0x8] sm:$0xff] }
   0x2   :  { %v21_v1 = vld [vmem:[%s345_s1] sm:$0xff]  ;;  %230 = vmatprep.subr.msk.mxu0 %vm43_vm0, %v23_v0 }
   0x3   :  { %232 = vmatprep.mubr.msk.f32.mxu0 %vm36_vm1, %v21_v1  ;;  %v24_v3 = vld [vmem:[%s346_s2] sm:$0xff] }
   0x4   :  { %10 = vsyncpa [#allocation3], 0  ;;  %231 = vmatpush3.msk.msra.mxu0 %vm43_vm0, %v23_v0  ;;  %v276_v4 = vmov 0   ;;  %v25_v5 = vld [vmem:[%s346_s2 + $0x8] sm:$0xff]  ;;  %v277_v6 = vmov 0.0|0.0   ;;  %vm278_vm2 = vmmov 0  }
   0x5   :  { %250 = vset.pattern.permute.xlu0 %v276_v4  ;;  %233 = vmatmul.mubr.msk.f32.vlgmr.msra.gmra.mrb[0].mxu0 %vm36_vm1, %v22_v2  ;;  %v279_v7 = vmov 0.0   ;;  %v125_v8 = vld [vmem:[%s348_s4] sm:$0x3]  ;;  %vm131_vm3 = vcmask 130048   ;;  %s280_s29 = smov [#allocation2]  }
   0x6   :  { %28 = vperm.xlu0 %250, %v24_v3   ;;  %251 = vset.pattern.permute.xlu1 %v276_v4  ;;  %v124_v18 = vld [vmem:[%s347_s3] sm:$0x3]  ;;  %s212_s4 = sshll.u32 %s280_s29, 4  ;;  %s213_s4 = int_to_ptr.vmem [resolvable:$true] %s212_s4 }
   0x7   :  { %242 = vmatprep.subr.bf16.mxu1 %v277_v6  ;;  %239 = vmatprep.mubr.msk.f32.mxu1 %vm278_vm2, %v279_v7  ;;  %s252_s30 = scalar_lea.vmem %s213_s4, 32  ;;  %p257_p1 = scmp.lt.s32.totalorder %s213_s4, %s213_s4 }
   0x8   :  { %128 = vperm.xlu1 %251, %v125_v8   ;;  %p253_p0 = scmp.ne.s32.totalorder %s213_s4, %s252_s30  ;;  %p258_p2 = scmp.lt.s32.totalorder %s252_s30, %s252_s30 }
   0xa   :  { %33 = vperm.xlu0 %250, %v25_v5   ;;  %p259_p3 = por %p258_p2, %p257_p1 }
   0xc   :  { %p260_p4 = pnand %p259_p3, %p253_p0 }
  0x85   :  { %v29_v9 = vpop.permute.xlu0 %28 }
  0x87   :  { %v129_v19 = vpop.permute.xlu1 %128 }
  0x89   :  { %v34_v10 = vpop.permute.xlu0 %33 }
  0xd8   :  { %v234_v11 = vpop.f32.mrb[0].mxu0 }
  0xd9   :  { %v119_v12 = vadd.f32 %v234_v11, %v34_v10  ;;  %v113_v13 = vpop.f32.mrb[1].mxu0 }
  0xda   :  { %v114_v14 = vadd.f32 %v113_v13, %v29_v9 }
  0xdb   :  { %v123_v15 = vmax.f32 %v119_v12, 0.0 }
  0xdc   :  { %v122_v16 = vmax.f32 %v114_v14, 0.0 }
  0xde   :  { %v243_v17 = vpack.c.bf16 %v123_v15, %v122_v16 }
  0xe0   :  { %244 = vmatpush3.bf16.msra.mxu1 %v243_v17 }
  0xe3   :  { %240 = vmatmul.mubr.msk.f32.vlgmr.msra.gmra.mrb[0].mxu1 %vm131_vm3, %v124_v18 }
 0x1b6   :  { %v201_v20 = vpop.f32.mrb[0].mxu1 }
 0x1b7   :  { %v202_v21 = vadd.f32 %v201_v20, %v129_v19  ;;  %v241_v22 = vpop.f32.mrb[1].mxu1 }
 0x1b9   :  { %205 = vst [vmem:[#allocation2] sm:$0x3] %v202_v21 }
 0x1ba   :  { %263 = shalt.err (!%p260_p4)
}
 0x1bb   :  { %s264_s3 = scalar_lea.hbm %s349_s5, 32 }
 0x1bc   :  { %p265_p5 = scmp.ne.s32.totalorder %s349_s5, %s264_s3  ;;  %p268_p6 = scmp.lt.u32.totalorder %s264_s3, %s349_s5 }
 0x1be   :  { %p270_p7 = pnand %p268_p6, %p265_p5 }
 0x1c0   :  { %273 = shalt.err (!%p270_p7)
}
 0x1c1   :  { %215 = dma.vmem_to_hbm [thread:$0]  %s213_s4, 32, %s349_s5, [#allocation3]  }
 0x1c2   :  { %274 = dma.done.wait [#allocation3], 32  }
 0x1c3   :  { %275 = vsyncadd [#allocation3], 4294967264 }
 0x1c4   :  { %219 = vsyncpa [#allocation3], 1 }

</bundles_post_ra>
